<compile_context>
chip_gen: v7x
topology: tpu7x:2x2x1
jax: 0.10.0
libtpu: 0.0.40
codegen_flags: <defaults>
</compile_context>

<pallas_src>
import jax
import jax.numpy as jnp
from jax.experimental import pallas as pl
from jax.experimental.pallas import tpu as pltpu

D_IN = 768          # encoder input / decoder output features
D_HID = 64          # bottleneck
DEC_CHUNK = 256     # decoder output-column chunk (2 x 128 lanes)
N_DEC_CHUNKS = D_IN // DEC_CHUNK  # 3


def ae_kernel(x_ref, w_enc_ref, b_enc_ref, w_dec_ref, b_dec_ref, o_ref):
    # Encoder: [TB, 768] @ [768, 64] + [1, 64], f32 MXU accumulation.
    h = jnp.dot(x_ref[...], w_enc_ref[...], preferred_element_type=jnp.float32)
    # Bias-add + ReLU in f32 (v5e VPU has no bf16 path).
    h = jnp.maximum(h + b_enc_ref[...], 0.0)
    # Feed the decoder MXU in the weight dtype (no-op for f32, bf16 when enabled).
    h = h.astype(w_dec_ref.dtype)

    # Decoder, split over output-column chunks so the [TB, 768] f32 result is
    # never fully live: each chunk drains straight into o_ref. Static Python
    # offsets -> static, unmasked, lane-dense (256-lane) stores.
    for c in range(N_DEC_CHUNKS):
        sl = pl.ds(c * DEC_CHUNK, DEC_CHUNK)
        y = jnp.dot(h, w_dec_ref[:, sl], preferred_element_type=jnp.float32)
        o_ref[:, sl] = (y + b_dec_ref[:, sl]).astype(o_ref.dtype)


def my_ae_64_forward(x, w_enc, b_enc, w_dec, b_dec, *, tb=512, use_bf16=False):
    """x: [B, 768].  w_enc: [768, 64], b_enc: [64], w_dec: [64, 768], b_dec: [768].

    tb:       batch rows per tile (multiple of 8); 512 rows = 1.5 MiB f32 x-tile,
              ~6 MiB total double-buffered x/out + ~0.4 MiB resident weights,
              well within the 32 MiB default scoped VMEM on v5e/v6e/v7x.
    use_bf16: cast x and weight matrices to bf16 (f32 accumulation, f32 output)
              to halve HBM traffic / hit the fast MXU path on v6e/v7x.
    """
    assert x.ndim == 2 and x.shape[1] == D_IN
    assert tb % 8 == 0
    B = x.shape[0]
    out_dtype = x.dtype

    if use_bf16:
        x = x.astype(jnp.bfloat16)
        w_enc = w_enc.astype(jnp.bfloat16)
        w_dec = w_dec.astype(jnp.bfloat16)

    # Biases stay f32 and are passed as [1, N] rows (2-D VMEM tiles, broadcast
    # over the batch inside the kernel).
    b_enc2 = b_enc.astype(jnp.float32).reshape(1, D_HID)
    b_dec2 = b_dec.astype(jnp.float32).reshape(1, D_IN)

    # Batch tiling: tiles must be a multiple of 8 sublanes. Pad the batch so
    # every grid step sees a full tile (no partial-tile masking needed).
    B8 = ((B + 7) // 8) * 8
    TB = min(tb, B8)
    Bp = ((B8 + TB - 1) // TB) * TB
    if Bp != B:
        x = jnp.pad(x, ((0, Bp - B), (0, 0)))
    grid = (Bp // TB,)

    out = pl.pallas_call(
        ae_kernel,
        out_shape=jax.ShapeDtypeStruct((Bp, D_IN), out_dtype),
        grid_spec=pltpu.PrefetchScalarGridSpec(
            num_scalar_prefetch=0,
            grid=grid,
            in_specs=[
                pl.BlockSpec((TB, D_IN), lambda i: (i, 0)),      # x: tiled over batch
                pl.BlockSpec((D_IN, D_HID), lambda i: (0, 0)),   # w_enc: VMEM-resident
                pl.BlockSpec((1, D_HID), lambda i: (0, 0)),      # b_enc: resident
                pl.BlockSpec((D_HID, D_IN), lambda i: (0, 0)),   # w_dec: resident
                pl.BlockSpec((1, D_IN), lambda i: (0, 0)),       # b_dec: resident
            ],
            out_specs=pl.BlockSpec((TB, D_IN), lambda i: (i, 0)),
        ),
        compiler_params=pltpu.CompilerParams(
            # Independent batch tiles -> parallel (lets v7x split tiles over its 2 TCs).
            dimension_semantics=("parallel",),
        ),
    )(x, w_enc, b_enc2, w_dec, b_dec2)

    return out[:B] if Bp != B else out


def init_params(key):
    """Deterministic init mimicking nn.Linear (uniform +- 1/sqrt(fan_in)).

    PyTorch stores Linear weight as [out, in]; we return the transposed [in, out]
    form used by the kernel (y = x @ W + b); semantics are identical.
    """
    k1, k2, k3, k4 = jax.random.split(key, 4)
    bound_enc = 1.0 / jnp.sqrt(jnp.float32(D_IN))
    bound_dec = 1.0 / jnp.sqrt(jnp.float32(D_HID))
    w_enc = jax.random.uniform(k1, (D_IN, D_HID), jnp.float32, -bound_enc, bound_enc)
    b_enc = jax.random.uniform(k2, (D_HID,), jnp.float32, -bound_enc, bound_enc)
    w_dec = jax.random.uniform(k3, (D_HID, D_IN), jnp.float32, -bound_dec, bound_dec)
    b_dec = jax.random.uniform(k4, (D_IN,), jnp.float32, -bound_dec, bound_dec)
    return w_enc, b_enc, w_dec, b_dec


if __name__ == "__main__":
    key = jax.random.PRNGKey(0)
    k_x, k_p = jax.random.split(key)

    w_enc, b_enc, w_dec, b_dec = init_params(k_p)

    # 1) Small single-tile case (B=8, default tile).
    B1 = 8
    x1 = jax.random.normal(k_x, (B1, D_IN), jnp.float32)
    out1 = jax.block_until_ready(my_ae_64_forward(x1, w_enc, b_enc, w_dec, b_dec))
    ref1 = jnp.maximum(x1 @ w_enc + b_enc, 0.0) @ w_dec + b_dec
    assert out1.shape == (B1, D_IN)
    assert jnp.allclose(out1, ref1, atol=1e-4, rtol=1e-4)

    # 2) Multi-tile case with batch padding (B=20, tb=8 -> grid of 3 full tiles).
    B2 = 20
    x2 = jax.random.normal(jax.random.PRNGKey(1), (B2, D_IN), jnp.float32)
    out2 = jax.block_until_ready(
        my_ae_64_forward(x2, w_enc, b_enc, w_dec, b_dec, tb=8))
    ref2 = jnp.maximum(x2 @ w_enc + b_enc, 0.0) @ w_dec + b_dec
    assert out2.shape == (B2, D_IN)
    assert jnp.allclose(out2, ref2, atol=1e-4, rtol=1e-4)

    # 3) Optional bf16 input/weight path (f32 accumulation + f32 output); loose check.
    out3 = jax.block_until_ready(
        my_ae_64_forward(x2, w_enc, b_enc, w_dec, b_dec, tb=8, use_bf16=True))
    assert out3.shape == (B2, D_IN)
    assert out3.dtype == jnp.float32
    assert jnp.allclose(out3, ref2, atol=1e-1, rtol=1e-1)

    print("KERNEL_OK")
</pallas_src>

<mosaic_0001>
module attributes {stable_mosaic.version = 11 : i64} {
  func.func @ae_kernel(%arg0: i32, %arg1: memref<8x768xf32, #tpu.memory_space<vmem>>, %arg2: memref<768x64xf32, #tpu.memory_space<vmem>>, %arg3: memref<1x64xf32, #tpu.memory_space<vmem>>, %arg4: memref<64x768xf32, #tpu.memory_space<vmem>>, %arg5: memref<1x768xf32, #tpu.memory_space<vmem>>, %arg6: memref<8x768xf32, #tpu.memory_space<vmem>>) attributes {dimension_semantics = [#tpu.dimension_semantics<parallel>], iteration_bounds = array<i64: 1>, scalar_prefetch = 0 : i64, scratch_operands = 0 : i64, tpu.core_type = #tpu.core_type<tc>, window_params = [{transform_indices = @transform_0, window_bounds = array<i64: 8, 768>}, {pipeline_mode = #tpu.pipeline_mode<synchronous>, transform_indices = @transform_1, window_bounds = array<i64: 768, 64>}, {pipeline_mode = #tpu.pipeline_mode<synchronous>, transform_indices = @transform_2, window_bounds = array<i64: 1, 64>}, {pipeline_mode = #tpu.pipeline_mode<synchronous>, transform_indices = @transform_3, window_bounds = array<i64: 64, 768>}, {pipeline_mode = #tpu.pipeline_mode<synchronous>, transform_indices = @transform_4, window_bounds = array<i64: 1, 768>}, {transform_indices = @transform_5, window_bounds = array<i64: 8, 768>}]} {
    %c0 = arith.constant 0 : index
    %c0_0 = arith.constant 0 : index
    %0 = vector.load %arg1[%c0, %c0_0] : memref<8x768xf32, #tpu.memory_space<vmem>>, vector<8x768xf32>
    %c0_1 = arith.constant 0 : index
    %c0_2 = arith.constant 0 : index
    %1 = vector.load %arg2[%c0_1, %c0_2] : memref<768x64xf32, #tpu.memory_space<vmem>>, vector<768x64xf32>
    %cst = arith.constant dense<0.000000e+00> : vector<8x64xf32>
    %2 = tpu.matmul %0, %1, %cst {dimension_numbers = #tpu.dot_dimension_numbers<[1], [0], [0], [1], [0, 0, 1, 1], [], []>} : vector<8x768xf32>, vector<768x64xf32>, vector<8x64xf32> -> vector<8x64xf32>
    %c0_3 = arith.constant 0 : index
    %c0_4 = arith.constant 0 : index
    %3 = vector.load %arg3[%c0_3, %c0_4] : memref<1x64xf32, #tpu.memory_space<vmem>>, vector<1x64xf32>
    %4 = vector.broadcast %3 : vector<1x64xf32> to vector<8x64xf32>
    %5 = arith.addf %2, %4 : vector<8x64xf32>
    %cst_5 = arith.constant 0.000000e+00 : f32
    %6 = vector.broadcast %cst_5 : f32 to vector<8x64xf32>
    %7 = arith.maximumf %5, %6 : vector<8x64xf32>
    %c0_6 = arith.constant 0 : index
    %c0_7 = arith.constant 0 : index
    %8 = vector.load %arg4[%c0_6, %c0_7] : memref<64x768xf32, #tpu.memory_space<vmem>>, vector<64x256xf32>
    %cst_8 = arith.constant dense<0.000000e+00> : vector<8x256xf32>
    %9 = tpu.matmul %7, %8, %cst_8 {dimension_numbers = #tpu.dot_dimension_numbers<[1], [0], [0], [1], [0, 0, 1, 1], [], []>} : vector<8x64xf32>, vector<64x256xf32>, vector<8x256xf32> -> vector<8x256xf32>
    %c0_9 = arith.constant 0 : index
    %c0_10 = arith.constant 0 : index
    %10 = vector.load %arg5[%c0_9, %c0_10] : memref<1x768xf32, #tpu.memory_space<vmem>>, vector<1x256xf32>
    %11 = vector.broadcast %10 : vector<1x256xf32> to vector<8x256xf32>
    %12 = arith.addf %9, %11 : vector<8x256xf32>
    %c0_11 = arith.constant 0 : index
    %c0_12 = arith.constant 0 : index
    %13 = vector.load %arg6[%c0_11, %c0_12] : memref<8x768xf32, #tpu.memory_space<vmem>>, vector<8x256xf32>
    tpu.vector_store %arg6[%c0_11, %c0_12], %12 {strides = array<i32>} : memref<8x768xf32, #tpu.memory_space<vmem>>, vector<8x256xf32>,
    %c0_13 = arith.constant 0 : index
    %c256 = arith.constant 256 : index
    %14 = vector.load %arg4[%c0_13, %c256] : memref<64x768xf32, #tpu.memory_space<vmem>>, vector<64x256xf32>
    %cst_14 = arith.constant dense<0.000000e+00> : vector<8x256xf32>
    %15 = tpu.matmul %7, %14, %cst_14 {dimension_numbers = #tpu.dot_dimension_numbers<[1], [0], [0], [1], [0, 0, 1, 1], [], []>} : vector<8x64xf32>, vector<64x256xf32>, vector<8x256xf32> -> vector<8x256xf32>
    %c0_15 = arith.constant 0 : index
    %c256_16 = arith.constant 256 : index
    %16 = vector.load %arg5[%c0_15, %c256_16] : memref<1x768xf32, #tpu.memory_space<vmem>>, vector<1x256xf32>
    %17 = vector.broadcast %16 : vector<1x256xf32> to vector<8x256xf32>
    %18 = arith.addf %15, %17 : vector<8x256xf32>
    %c0_17 = arith.constant 0 : index
    %c256_18 = arith.constant 256 : index
    %19 = vector.load %arg6[%c0_17, %c256_18] : memref<8x768xf32, #tpu.memory_space<vmem>>, vector<8x256xf32>
    tpu.vector_store %arg6[%c0_17, %c256_18], %18 {strides = array<i32>} : memref<8x768xf32, #tpu.memory_space<vmem>>, vector<8x256xf32>,
    %c0_19 = arith.constant 0 : index
    %c512 = arith.constant 512 : index
    %20 = vector.load %arg4[%c0_19, %c512] : memref<64x768xf32, #tpu.memory_space<vmem>>, vector<64x256xf32>
    %cst_20 = arith.constant dense<0.000000e+00> : vector<8x256xf32>
    %21 = tpu.matmul %7, %20, %cst_20 {dimension_numbers = #tpu.dot_dimension_numbers<[1], [0], [0], [1], [0, 0, 1, 1], [], []>} : vector<8x64xf32>, vector<64x256xf32>, vector<8x256xf32> -> vector<8x256xf32>
    %c0_21 = arith.constant 0 : index
    %c512_22 = arith.constant 512 : index
    %22 = vector.load %arg5[%c0_21, %c512_22] : memref<1x768xf32, #tpu.memory_space<vmem>>, vector<1x256xf32>
    %23 = vector.broadcast %22 : vector<1x256xf32> to vector<8x256xf32>
    %24 = arith.addf %21, %23 : vector<8x256xf32>
    %c0_23 = arith.constant 0 : index
    %c512_24 = arith.constant 512 : index
    %25 = vector.load %arg6[%c0_23, %c512_24] : memref<8x768xf32, #tpu.memory_space<vmem>>, vector<8x256xf32>
    tpu.vector_store %arg6[%c0_23, %c512_24], %24 {strides = array<i32>} : memref<8x768xf32, #tpu.memory_space<vmem>>, vector<8x256xf32>,
    return
  }
  func.func @transform_0(%arg0: i32) -> (i32, i32) {
    %c0_i32 = arith.constant 0 : i32
    %c0_i32_0 = arith.constant 0 : i32
    return %arg0, %c0_i32 : i32, i32
  }
  func.func @transform_1(%arg0: i32) -> (i32, i32) {
    %c0_i32 = arith.constant 0 : i32
    %c0_i32_0 = arith.constant 0 : i32
    %c0_i32_1 = arith.constant 0 : i32
    return %c0_i32, %c0_i32_0 : i32, i32
  }
  func.func @transform_2(%arg0: i32) -> (i32, i32) {
    %c0_i32 = arith.constant 0 : i32
    %c0_i32_0 = arith.constant 0 : i32
    %c0_i32_1 = arith.constant 0 : i32
    return %c0_i32, %c0_i32_0 : i32, i32
  }
  func.func @transform_3(%arg0: i32) -> (i32, i32) {
    %c0_i32 = arith.constant 0 : i32
    %c0_i32_0 = arith.constant 0 : i32
    %c0_i32_1 = arith.constant 0 : i32
    return %c0_i32, %c0_i32_0 : i32, i32
  }
  func.func @transform_4(%arg0: i32) -> (i32, i32) {
    %c0_i32 = arith.constant 0 : i32
    %c0_i32_0 = arith.constant 0 : i32
    %c0_i32_1 = arith.constant 0 : i32
    return %c0_i32, %c0_i32_0 : i32, i32
  }
  func.func @transform_5(%arg0: i32) -> (i32, i32) {
    %c0_i32 = arith.constant 0 : i32
    %c0_i32_0 = arith.constant 0 : i32
    return %arg0, %c0_i32 : i32, i32
  }
}

</mosaic_0001>

<bundles_post_ra>
// kernel: tpu_custom_call.1
= control target key start
LH: loop header
LB: loop body
LE: loop exit
PB: predicated region body
PF: predicated region fallthrough
CT: control target
= control target key end

     0   :  { %s1450_s0 = inlined_call_operand.vmem [shape: f32[8,768], index: 0, kind: input, shape index: {}]   ;;  %s1451_s1 = inlined_call_operand.vmem [shape: f32[768,64], index: 1, kind: input, shape index: {}]   ;;  %s1452_s2 = inlined_call_operand.vmem [shape: f32[1,64], index: 2, kind: input, shape index: {}]   ;;  %s1453_s3 = inlined_call_operand.vmem [shape: f32[64,768], index: 3, kind: input, shape index: {}]   ;;  %s1454_s4 = inlined_call_operand.vmem [shape: f32[1,768], index: 4, kind: input, shape index: {}]   ;;  %s1455_s5 = inlined_call_operand.hbm [shape: f32[8,768], index: 5, kind: output, shape index: {}]  }
   0x1   :  { %v43_v0 = vld [vmem:[%s1451_s1 + $0x80] sm:$0xff]  ;;  %v44_v1 = vld [vmem:[%s1451_s1 + $0x88] sm:$0xff]  ;;  %v45_v11 = vld [vmem:[%s1451_s1 + $0x90] sm:$0xff] }
   0x2   :  { %v27_v2 = vld [vmem:[%s1451_s1] sm:$0xff]  ;;  %v771_v3 = vpack.c.bf16 %v44_v1, %v43_v0  ;;  %v28_v4 = vld [vmem:[%s1451_s1 + $0x8] sm:$0xff]  ;;  %v46_v13 = vld [vmem:[%s1451_s1 + $0x98] sm:$0xff] }
   0x3   :  { %v75_v5 = vld [vmem:[%s1451_s1 + $0x180] sm:$0xff]  ;;  %v76_v6 = vld [vmem:[%s1451_s1 + $0x188] sm:$0xff]  ;;  %v773_v7 = vpack.c.bf16 %v28_v4, %v27_v2  ;;  %v29_v14 = vld [vmem:[%s1451_s1 + $0x10] sm:$0xff]  ;;  %v775_v16 = vpack.c.bf16 %v46_v13, %v45_v11 }
   0x4   :  { %v803_v8 = vpack.c.bf16 %v76_v6, %v75_v5  ;;  %v59_v9 = vld [vmem:[%s1451_s1 + $0x100] sm:$0xff]  ;;  %v60_v10 = vld [vmem:[%s1451_s1 + $0x108] sm:$0xff]  ;;  %772 = vmatprep.subr.bf16.mxu0 %v771_v3  ;;  %v30_v15 = vld [vmem:[%s1451_s1 + $0x18] sm:$0xff] }
   0x5   :  { %v805_v12 = vpack.c.bf16 %v60_v10, %v59_v9  ;;  %774 = vmatpush3.bf16.msra.mxu0 %v773_v7  ;;  %v777_v17 = vpack.c.bf16 %v30_v15, %v29_v14  ;;  %v77_v18 = vld [vmem:[%s1451_s1 + $0x190] sm:$0xff]  ;;  %v78_v19 = vld [vmem:[%s1451_s1 + $0x198] sm:$0xff]  ;;  %v47_v23 = vld [vmem:[%s1451_s1 + $0xa0] sm:$0xff] }
   0x6   :  { %804 = vmatprep.subr.bf16.mxu1 %v803_v8  ;;  %v61_v20 = vld [vmem:[%s1451_s1 + $0x110] sm:$0xff]  ;;  %v807_v21 = vpack.c.bf16 %v78_v19, %v77_v18  ;;  %v62_v22 = vld [vmem:[%s1451_s1 + $0x118] sm:$0xff]  ;;  %v48_v24 = vld [vmem:[%s1451_s1 + $0xa8] sm:$0xff]  ;;  %776 = vmatprep.subr.bf16.mxu0 %v775_v16 }
   0x7   :  { %806 = vmatpush3.bf16.msra.mxu1 %v805_v12  ;;  %v809_v25 = vpack.c.bf16 %v62_v22, %v61_v20  ;;  %v779_v26 = vpack.c.bf16 %v48_v24, %v47_v23  ;;  %v31_v27 = vld [vmem:[%s1451_s1 + $0x20] sm:$0xff]  ;;  %v32_v28 = vld [vmem:[%s1451_s1 + $0x28] sm:$0xff]  ;;  %v49_v35 = vld [vmem:[%s1451_s1 + $0xb0] sm:$0xff] }
   0x8   :  { %v79_v29 = vld [vmem:[%s1451_s1 + $0x1a0] sm:$0xff]  ;;  %808 = vmatprep.subr.bf16.mxu1 %v807_v21  ;;  %v80_v30 = vld [vmem:[%s1451_s1 + $0x1a8] sm:$0xff]  ;;  %v781_v33 = vpack.c.bf16 %v32_v28, %v31_v27  ;;  %v50_v36 = vld [vmem:[%s1451_s1 + $0xb8] sm:$0xff] }
   0x9   :  { %v63_v31 = vld [vmem:[%s1451_s1 + $0x120] sm:$0xff]  ;;  %v64_v32 = vld [vmem:[%s1451_s1 + $0x128] sm:$0xff]  ;;  %778 = vmatpush3.bf16.msra.mxu0 %v777_v17  ;;  %v811_v34 = vpack.c.bf16 %v80_v30, %v79_v29  ;;  %v33_v37 = vld [vmem:[%s1451_s1 + $0x30] sm:$0xff]  ;;  %v783_v39 = vpack.c.bf16 %v50_v36, %v49_v35 }
   0xa   :  { %780 = vmatprep.subr.bf16.mxu0 %v779_v26  ;;  %v813_v38 = vpack.c.bf16 %v64_v32, %v63_v31  ;;  %v34_v40 = vld [vmem:[%s1451_s1 + $0x38] sm:$0xff]  ;;  %v81_v41 = vld [vmem:[%s1451_s1 + $0x1b0] sm:$0xff]  ;;  %v51_v46 = vld [vmem:[%s1451_s1 + $0xc0] sm:$0xff] }
   0xb   :  { %810 = vmatpush3.bf16.msra.mxu1 %v809_v25  ;;  %v82_v42 = vld [vmem:[%s1451_s1 + $0x1b8] sm:$0xff]  ;;  %v65_v44 = vld [vmem:[%s1451_s1 + $0x130] sm:$0xff]  ;;  %v52_v47 = vld [vmem:[%s1451_s1 + $0xc8] sm:$0xff]  ;;  %v785_v48 = vpack.c.bf16 %v34_v40, %v33_v37 }
   0xc   :  { %812 = vmatprep.subr.bf16.mxu1 %v811_v34  ;;  %v815_v43 = vpack.c.bf16 %v82_v42, %v81_v41  ;;  %v66_v45 = vld [vmem:[%s1451_s1 + $0x138] sm:$0xff]  ;;  %v83_v49 = vld [vmem:[%s1451_s1 + $0x1c0] sm:$0xff]  ;;  %v84_v50 = vld [vmem:[%s1451_s1 + $0x1c8] sm:$0xff]  ;;  %v787_v52 = vpack.c.bf16 %v52_v47, %v51_v46 }
   0xd   :  { %782 = vmatpush3.bf16.msra.mxu0 %v781_v33  ;;  %v817_v51 = vpack.c.bf16 %v66_v45, %v65_v44  ;;  %v35_v53 = vld [vmem:[%s1451_s1 + $0x40] sm:$0xff]  ;;  %v36_v54 = vld [vmem:[%s1451_s1 + $0x48] sm:$0xff]  ;;  %v819_v56 = vpack.c.bf16 %v84_v50, %v83_v49  ;;  %v53_v58 = vld [vmem:[%s1451_s1 + $0xd0] sm:$0xff] }
   0xe   :  { %784 = vmatprep.subr.bf16.mxu0 %v783_v39  ;;  %v67_v55 = vld [vmem:[%s1451_s1 + $0x140] sm:$0xff]  ;;  %v68_v57 = vld [vmem:[%s1451_s1 + $0x148] sm:$0xff]  ;;  %v54_v59 = vld [vmem:[%s1451_s1 + $0xd8] sm:$0xff]  ;;  %v789_v62 = vpack.c.bf16 %v36_v54, %v35_v53 }
   0xf   :  { %814 = vmatpush3.bf16.msra.mxu1 %v813_v38  ;;  %v85_v60 = vld [vmem:[%s1451_s1 + $0x1d0] sm:$0xff]  ;;  %v86_v61 = vld [vmem:[%s1451_s1 + $0x1d8] sm:$0xff]  ;;  %v821_v63 = vpack.c.bf16 %v68_v57, %v67_v55  ;;  %v791_v0 = vpack.c.bf16 %v54_v59, %v53_v58  ;;  %v55_v6 = vld [vmem:[%s1451_s1 + $0xe0] sm:$0xff] }
  0x10   :  { %816 = vmatprep.subr.bf16.mxu1 %v815_v43  ;;  %v37_v1 = vld [vmem:[%s1451_s1 + $0x50] sm:$0xff]  ;;  %v38_v2 = vld [vmem:[%s1451_s1 + $0x58] sm:$0xff]  ;;  %v823_v4 = vpack.c.bf16 %v86_v61, %v85_v60  ;;  %v56_v7 = vld [vmem:[%s1451_s1 + $0xe8] sm:$0xff] }
  0x11   :  { %786 = vmatpush3.bf16.msra.mxu0 %v785_v48  ;;  %v69_v3 = vld [vmem:[%s1451_s1 + $0x150] sm:$0xff]  ;;  %v70_v5 = vld [vmem:[%s1451_s1 + $0x158] sm:$0xff]  ;;  %v87_v8 = vld [vmem:[%s1451_s1 + $0x1e0] sm:$0xff]  ;;  %v793_v10 = vpack.c.bf16 %v38_v2, %v37_v1  ;;  %v795_v14 = vpack.c.bf16 %v56_v7, %v55_v6 }
  0x12   :  { %788 = vmatprep.subr.bf16.mxu0 %v787_v52  ;;  %v88_v9 = vld [vmem:[%s1451_s1 + $0x1e8] sm:$0xff]  ;;  %v39_v11 = vld [vmem:[%s1451_s1 + $0x60] sm:$0xff]  ;;  %v825_v13 = vpack.c.bf16 %v70_v5, %v69_v3  ;;  %v57_v19 = vld [vmem:[%s1451_s1 + $0xf0] sm:$0xff] }
  0x13   :  { %818 = vmatpush3.bf16.msra.mxu1 %v817_v51  ;;  %v22_v12 = vld [vmem:[%s1450_s0 + $0x8] sm:$0xff]  ;;  %v71_v16 = vld [vmem:[%s1451_s1 + $0x160] sm:$0xff]  ;;  %v827_v18 = vpack.c.bf16 %v88_v9, %v87_v8  ;;  %v58_v20 = vld [vmem:[%s1451_s1 + $0xf8] sm:$0xff] }
  0x14   :  { %820 = vmatprep.subr.bf16.mxu1 %v819_v56  ;;  %v40_v15 = vld [vmem:[%s1451_s1 + $0x68] sm:$0xff]  ;;  %194 = vmatprep.mubr.f32.mxu0 %v22_v12  ;;  %v24_v21 = vld [vmem:[%s1450_s0 + $0x18] sm:$0xff]  ;;  %v89_v22 = vld [vmem:[%s1451_s1 + $0x1f0] sm:$0xff]  ;;  %v799_v26 = vpack.c.bf16 %v58_v20, %v57_v19 }
  0x15   :  { %790 = vmatpush3.bf16.msra.mxu0 %v789_v62  ;;  %v72_v17 = vld [vmem:[%s1451_s1 + $0x168] sm:$0xff]  ;;  %v90_v23 = vld [vmem:[%s1451_s1 + $0x1f8] sm:$0xff]  ;;  %264 = vmatprep.mubr.f32.mxu1 %v24_v21  ;;  %v797_v24 = vpack.c.bf16 %v40_v15, %v39_v11  ;;  %v41_v27 = vld [vmem:[%s1451_s1 + $0x70] sm:$0xff] }
  0x16   :  { %792 = vmatprep.subr.bf16.mxu0 %v791_v0  ;;  %v829_v25 = vpack.c.bf16 %v72_v17, %v71_v16  ;;  %v42_v28 = vld [vmem:[%s1451_s1 + $0x78] sm:$0xff]  ;;  %v73_v29 = vld [vmem:[%s1451_s1 + $0x170] sm:$0xff]  ;;  %v831_v30 = vpack.c.bf16 %v90_v23, %v89_v22  ;;  %v107_v32 = vld [vmem:[%s1451_s1 + $0x280] sm:$0xff] }
  0x17   :  { %822 = vmatpush3.bf16.msra.mxu1 %v821_v63  ;;  %v74_v31 = vld [vmem:[%s1451_s1 + $0x178] sm:$0xff]  ;;  %v108_v33 = vld [vmem:[%s1451_s1 + $0x288] sm:$0xff]  ;;  %v801_v34 = vpack.c.bf16 %v42_v28, %v41_v27  ;;  %v91_v37 = vld [vmem:[%s1451_s1 + $0x200] sm:$0xff] }
  0x18   :  { %824 = vmatprep.subr.bf16.mxu1 %v823_v4  ;;  %v833_v35 = vpack.c.bf16 %v74_v31, %v73_v29  ;;  %v835_v36 = vpack.c.bf16 %v108_v33, %v107_v32  ;;  %v92_v38 = vld [vmem:[%s1451_s1 + $0x208] sm:$0xff]  ;;  %v109_v39 = vld [vmem:[%s1451_s1 + $0x290] sm:$0xff]  ;;  %v110_v40 = vld [vmem:[%s1451_s1 + $0x298] sm:$0xff] }
  0x19   :  { %794 = vmatpush3.bf16.msra.mxu0 %v793_v10  ;;  %v21_v41 = vld [vmem:[%s1450_s0] sm:$0xff]  ;;  %v837_v42 = vpack.c.bf16 %v92_v38, %v91_v37  ;;  %v23_v43 = vld [vmem:[%s1450_s0 + $0x10] sm:$0xff]  ;;  %v839_v44 = vpack.c.bf16 %v110_v40, %v109_v39  ;;  %v94_v46 = vld [vmem:[%s1451_s1 + $0x218] sm:$0xff] }
  0x1a   :  { %796 = vmatprep.subr.bf16.mxu0 %v795_v14  ;;  %v93_v45 = vld [vmem:[%s1451_s1 + $0x210] sm:$0xff]  ;;  %v111_v47 = vld [vmem:[%s1451_s1 + $0x2a0] sm:$0xff]  ;;  %v112_v48 = vld [vmem:[%s1451_s1 + $0x2a8] sm:$0xff] }
  0x1b   :  { %826 = vmatpush3.bf16.msra.mxu1 %v825_v13  ;;  %v26_v49 = vld [vmem:[%s1450_s0 + $0x28] sm:$0xff] }
  0x1c   :  { %828 = vmatprep.subr.bf16.mxu1 %v827_v18 }
  0x1d   :  { %798 = vmatpush3.bf16.msra.mxu0 %v797_v24 }
  0x1e   :  { %800 = vmatprep.subr.bf16.mxu0 %v799_v26 }
  0x1f   :  { %830 = vmatpush3.bf16.msra.mxu1 %v829_v25 }
  0x20   :  { %832 = vmatprep.subr.bf16.mxu1 %v831_v30 }
  0x21   :  { %802 = vmatpush3.bf16.msra.mxu0 %v801_v34 }
  0x22   :  { %836 = vmatprep.subr.bf16.mxu0 %v835_v36 }
  0x23   :  { %834 = vmatpush3.bf16.msra.mxu1 %v833_v35 }
  0x24   :  { %10 = vsyncpa [#allocation3], 0  ;;  %195 = vmatmul.mubr.f32.vlgmr.msra.gmra.mrb[0].mxu0 %v21_v41  ;;  %v841_v50 = vpack.c.bf16 %v94_v46, %v93_v45  ;;  %v843_v51 = vpack.c.bf16 %v112_v48, %v111_v47  ;;  %v95_v52 = vld [vmem:[%s1451_s1 + $0x220] sm:$0xff]  ;;  %v96_v53 = vld [vmem:[%s1451_s1 + $0x228] sm:$0xff]  ;;  %vm369_vm0 = vcmask 523264  }
  0x25   :  { %838 = vmatpush3.bf16.msra.mxu0 %v837_v42  ;;  %334 = vmatprep.mubr.f32.mxu0 %v26_v49  ;;  %v113_v54 = vld [vmem:[%s1451_s1 + $0x2b0] sm:$0xff]  ;;  %v114_v55 = vld [vmem:[%s1451_s1 + $0x2b8] sm:$0xff]  ;;  %v845_v56 = vpack.c.bf16 %v96_v53, %v95_v52  ;;  %v115_v60 = vld [vmem:[%s1451_s1 + $0x2c0] sm:$0xff] }
  0x26   :  { %265 = vmatmul.mubr.f32.vlgmr.msra.gmra.mrb[0].mxu1 %v23_v43  ;;  %840 = vmatprep.subr.bf16.mxu0 %v839_v44  ;;  %v847_v57 = vpack.c.bf16 %v114_v55, %v113_v54  ;;  %v97_v58 = vld [vmem:[%s1451_s1 + $0x230] sm:$0xff]  ;;  %v98_v59 = vld [vmem:[%s1451_s1 + $0x238] sm:$0xff]  ;;  %v116_v61 = vld [vmem:[%s1451_s1 + $0x2c8] sm:$0xff] }
  0x27   :  { %v849_v62 = vpack.c.bf16 %v98_v59, %v97_v58  ;;  %v851_v63 = vpack.c.bf16 %v116_v61, %v115_v60  ;;  %v99_v0 = vld [vmem:[%s1451_s1 + $0x240] sm:$0xff]  ;;  %v100_v1 = vld [vmem:[%s1451_s1 + $0x248] sm:$0xff]  ;;  %v117_v2 = vld [vmem:[%s1451_s1 + $0x2d0] sm:$0xff] }
  0x28   :  { %v118_v3 = vld [vmem:[%s1451_s1 + $0x2d8] sm:$0xff]  ;;  %v853_v4 = vpack.c.bf16 %v100_v1, %v99_v0  ;;  %v101_v6 = vld [vmem:[%s1451_s1 + $0x250] sm:$0xff]  ;;  %v119_v8 = vld [vmem:[%s1451_s1 + $0x2e0] sm:$0xff] }
  0x29   :  { %842 = vmatpush3.bf16.msra.mxu0 %v841_v50  ;;  %v855_v5 = vpack.c.bf16 %v118_v3, %v117_v2  ;;  %v102_v7 = vld [vmem:[%s1451_s1 + $0x258] sm:$0xff]  ;;  %v120_v9 = vld [vmem:[%s1451_s1 + $0x2e8] sm:$0xff]  ;;  %v103_v12 = vld [vmem:[%s1451_s1 + $0x260] sm:$0xff] }
  0x2a   :  { %844 = vmatprep.subr.bf16.mxu0 %v843_v51  ;;  %v857_v10 = vpack.c.bf16 %v102_v7, %v101_v6  ;;  %v859_v11 = vpack.c.bf16 %v120_v9, %v119_v8  ;;  %v104_v13 = vld [vmem:[%s1451_s1 + $0x268] sm:$0xff]  ;;  %v121_v14 = vld [vmem:[%s1451_s1 + $0x2f0] sm:$0xff]  ;;  %v122_v15 = vld [vmem:[%s1451_s1 + $0x2f8] sm:$0xff]  ;;  %v941_v9 = vmov 0.0  }
  0x2b   :  { %v861_v16 = vpack.c.bf16 %v104_v13, %v103_v12  ;;  %v863_v17 = vpack.c.bf16 %v122_v15, %v121_v14  ;;  %v105_v18 = vld [vmem:[%s1451_s1 + $0x270] sm:$0xff]  ;;  %v106_v19 = vld [vmem:[%s1451_s1 + $0x278] sm:$0xff]  ;;  %v25_v21 = vld [vmem:[%s1450_s0 + $0x20] sm:$0xff]  ;;  %437 = vmatprep.mubr.f32.mxu1 %v941_v9 }
  0x2c   :  { %v865_v20 = vpack.c.bf16 %v106_v19, %v105_v18  ;;  %v342_v22 = vld [vmem:[%s1453_s3 + $0x8] sm:$0xff]  ;;  %v344_v23 = vld [vmem:[%s1453_s3 + $0x38] sm:$0xff]  ;;  %v341_v24 = vld [vmem:[%s1453_s3] sm:$0xff] }
  0x2d   :  { %846 = vmatpush3.bf16.msra.mxu0 %v845_v56  ;;  %v867_v25 = vpack.c.bf16 %v344_v23, %v342_v22  ;;  %v343_v26 = vld [vmem:[%s1453_s3 + $0x30] sm:$0xff]  ;;  %v548_v27 = vld [vmem:[%s1453_s3 + $0x28] sm:$0xff]  ;;  %v550_v28 = vld [vmem:[%s1453_s3 + $0x58] sm:$0xff] }
  0x2e   :  { %848 = vmatprep.subr.bf16.mxu0 %v847_v57  ;;  %v869_v29 = vpack.c.bf16 %v343_v26, %v341_v24  ;;  %v899_v30 = vpack.c.bf16 %v550_v28, %v548_v27  ;;  %v547_v31 = vld [vmem:[%s1453_s3 + $0x20] sm:$0xff]  ;;  %v549_v32 = vld [vmem:[%s1453_s3 + $0x50] sm:$0xff]  ;;  %v346_v33 = vld [vmem:[%s1453_s3 + $0x68] sm:$0xff] }
  0x2f   :  { %868 = vmatprep.subr.bf16.mxu1 %v867_v25  ;;  %v901_v34 = vpack.c.bf16 %v549_v32, %v547_v31  ;;  %v348_v35 = vld [vmem:[%s1453_s3 + $0x98] sm:$0xff]  ;;  %v345_v36 = vld [vmem:[%s1453_s3 + $0x60] sm:$0xff]  ;;  %v347_v37 = vld [vmem:[%s1453_s3 + $0x90] sm:$0xff] }
  0x30   :  { %870 = vmatpush1.bf16.msra.mxu1 %v869_v29  ;;  %v871_v38 = vpack.c.bf16 %v348_v35, %v346_v33  ;;  %v873_v39 = vpack.c.bf16 %v347_v37, %v345_v36  ;;  %v552_v40 = vld [vmem:[%s1453_s3 + $0x88] sm:$0xff]  ;;  %v554_v41 = vld [vmem:[%s1453_s3 + $0xb8] sm:$0xff]  ;;  %v551_v42 = vld [vmem:[%s1453_s3 + $0x80] sm:$0xff] }
  0x31   :  { %850 = vmatpush3.bf16.msra.mxu0 %v849_v62  ;;  %v903_v43 = vpack.c.bf16 %v554_v41, %v552_v40  ;;  %v553_v44 = vld [vmem:[%s1453_s3 + $0xb0] sm:$0xff]  ;;  %v350_v45 = vld [vmem:[%s1453_s3 + $0xc8] sm:$0xff]  ;;  %v352_v46 = vld [vmem:[%s1453_s3 + $0xf8] sm:$0xff] }
  0x32   :  { %852 = vmatprep.subr.bf16.mxu0 %v851_v63  ;;  %872 = vmatprep.subr.bf16.mxu1 %v871_v38  ;;  %v905_v47 = vpack.c.bf16 %v553_v44, %v551_v42  ;;  %v875_v48 = vpack.c.bf16 %v352_v46, %v350_v45  ;;  %v349_v49 = vld [vmem:[%s1453_s3 + $0xc0] sm:$0xff]  ;;  %v351_v50 = vld [vmem:[%s1453_s3 + $0xf0] sm:$0xff]  ;;  %v556_v51 = vld [vmem:[%s1453_s3 + $0xe8] sm:$0xff]  ;;  %v359_v45 = vlaneseq }
  0x33   :  { %v877_v52 = vpack.c.bf16 %v351_v50, %v349_v49  ;;  %v558_v53 = vld [vmem:[%s1453_s3 + $0x118] sm:$0xff]  ;;  %v555_v54 = vld [vmem:[%s1453_s3 + $0xe0] sm:$0xff]  ;;  %v557_v55 = vld [vmem:[%s1453_s3 + $0x110] sm:$0xff] }
  0x34   :  { %874 = vmatpush1.bf16.msra.mxu1 %v873_v39  ;;  %v907_v56 = vpack.c.bf16 %v558_v53, %v556_v51  ;;  %v909_v57 = vpack.c.bf16 %v557_v55, %v555_v54  ;;  %v354_v58 = vld [vmem:[%s1453_s3 + $0x128] sm:$0xff]  ;;  %v356_v59 = vld [vmem:[%s1453_s3 + $0x158] sm:$0xff]  ;;  %v353_v61 = vld [vmem:[%s1453_s3 + $0x120] sm:$0xff]  ;;  %v360_v46 = vshrl.u32 %v359_v45, 7 }
  0x35   :  { %854 = vmatpush3.bf16.msra.mxu0 %v853_v4  ;;  %876 = vmatprep.subr.bf16.mxu1 %v875_v48  ;;  %v879_v60 = vpack.c.bf16 %v356_v59, %v354_v58  ;;  %v355_v62 = vld [vmem:[%s1453_s3 + $0x150] sm:$0xff]  ;;  %v560_v63 = vld [vmem:[%s1453_s3 + $0x148] sm:$0xff]  ;;  %v562_v1 = vld [vmem:[%s1453_s3 + $0x178] sm:$0xff] }
  0x36   :  { %856 = vmatprep.subr.bf16.mxu0 %v855_v5  ;;  %v881_v0 = vpack.c.bf16 %v355_v62, %v353_v61  ;;  %v559_v2 = vld [vmem:[%s1453_s3 + $0x140] sm:$0xff]  ;;  %v561_v3 = vld [vmem:[%s1453_s3 + $0x170] sm:$0xff]  ;;  %v911_v4 = vpack.c.bf16 %v562_v1, %v560_v63  ;;  %v447_v6 = vld [vmem:[%s1453_s3 + $0x18] sm:$0xff]  ;;  %v365_v50 = vsub.s32 1, %v360_v46 }
  0x37   :  { %v913_v5 = vpack.c.bf16 %v561_v3, %v559_v2  ;;  %v449_v7 = vld [vmem:[%s1453_s3 + $0x48] sm:$0xff]  ;;  %v446_v22 = vld [vmem:[%s1453_s3 + $0x10] sm:$0xff]  ;;  %v448_v23 = vld [vmem:[%s1453_s3 + $0x40] sm:$0xff] }
  0x38   :  { %878 = vmatpush1.bf16.msra.mxu1 %v877_v52  ;;  %v883_v8 = vpack.c.bf16 %v449_v7, %v447_v6  ;;  %v451_v24 = vld [vmem:[%s1453_s3 + $0x78] sm:$0xff]  ;;  %v453_v25 = vld [vmem:[%s1453_s3 + $0xa8] sm:$0xff]  ;;  %v885_v27 = vpack.c.bf16 %v448_v23, %v446_v22  ;;  %v452_v31 = vld [vmem:[%s1453_s3 + $0xa0] sm:$0xff] }
  0x39   :  { %858 = vmatpush3.bf16.msra.mxu0 %v857_v10  ;;  %880 = vmatprep.subr.bf16.mxu1 %v879_v60  ;;  %v887_v29 = vpack.c.bf16 %v453_v25, %v451_v24  ;;  %v455_v32 = vld [vmem:[%s1453_s3 + $0xd8] sm:$0xff]  ;;  %v457_v33 = vld [vmem:[%s1453_s3 + $0x108] sm:$0xff]  ;;  %v454_v36 = vld [vmem:[%s1453_s3 + $0xd0] sm:$0xff] }
  0x3a   :  { %860 = vmatprep.subr.bf16.mxu0 %v859_v11  ;;  %v662_v11 = vld [vmem:[%s1452_s2] ss:$0 sm:$0xff]  ;;  %v891_v35 = vpack.c.bf16 %v457_v33, %v455_v32  ;;  %v459_v38 = vld [vmem:[%s1453_s3 + $0x138] sm:$0xff]  ;;  %v461_v39 = vld [vmem:[%s1453_s3 + $0x168] sm:$0xff]  ;;  %s942_s2 = smov [#allocation2]  }
  0x3b   :  { %v456_v37 = vld [vmem:[%s1453_s3 + $0x100] sm:$0xff]  ;;  %v895_v41 = vpack.c.bf16 %v461_v39, %v459_v38  ;;  %v458_v42 = vld [vmem:[%s1453_s3 + $0x130] sm:$0xff]  ;;  %s654_s16 = sshll.u32 %s942_s2, 4  ;;  %s655_s16 = int_to_ptr.vmem [resolvable:$true] %s654_s16 }
  0x3c   :  { %882 = vmatpush1.bf16.msra.mxu1 %v881_v0  ;;  %v893_v40 = vpack.c.bf16 %v456_v37, %v454_v36  ;;  %v357_v48 = vld [vmem:[%s1454_s4] sm:$0x3]  ;;  %v563_v49 = vld [vmem:[%s1454_s4 + $0x4] sm:$0x3]  ;;  %v462_v63 = vld [vmem:[%s1454_s4 + $0x2] sm:$0x3]  ;;  %p922_p1 = scmp.lt.s32.totalorder %s655_s16, %s655_s16 }
  0x3d   :  { %862 = vmatpush3.bf16.msra.mxu0 %v861_v16  ;;  %884 = vmatprep.subr.bf16.mxu1 %v883_v8  ;;  %v366_v53 = vrot.slane %v357_v48, %v365_v50  ;;  %v572_v54 = vrot.slane %v563_v49, %v365_v50  ;;  %v471_v1 = vrot.slane %v462_v63, %v365_v50  ;;  %s917_s17 = scalar_lea.vmem %s655_s16, 768 }
  0x3e   :  { %864 = vmatprep.subr.bf16.mxu0 %v863_v17  ;;  %p918_p0 = scmp.ne.s32.totalorder %s655_s16, %s917_s17  ;;  %p923_p2 = scmp.lt.s32.totalorder %s917_s17, %s917_s17 }
  0x40   :  { %p924_p3 = por %p923_p2, %p922_p1 }
  0x41   :  { %866 = vmatpush3.bf16.msra.mxu0 %v865_v20 }
  0x42   :  { %900 = vmatprep.subr.bf16.mxu0 %v899_v30  ;;  %v450_v30 = vld [vmem:[%s1453_s3 + $0x70] sm:$0xff]  ;;  %p925_p4 = pnand %p924_p3, %p918_p0 }
  0x44   :  { %335 = vmatmul.mubr.f32.vlgmr.msra.gmra.mrb[2].mxu0 %v25_v21 }
  0x45   :  { %902 = vmatpush1.bf16.msra.mxu0 %v901_v34  ;;  %639 = vmatprep.mubr.f32.mxu0 %v941_v9  ;;  %v889_v34 = vpack.c.bf16 %v452_v31, %v450_v30 }
  0x46   :  { %904 = vmatprep.subr.bf16.mxu0 %v903_v43  ;;  %v460_v43 = vld [vmem:[%s1453_s3 + $0x160] sm:$0xff] }
  0x47   :  { %v897_v44 = vpack.c.bf16 %v460_v43, %v458_v42 }
  0x49   :  { %906 = vmatpush1.bf16.msra.mxu0 %v905_v47  ;;  %v361_v47 = vsub.s32 0, %v360_v46 }
  0x4a   :  { %908 = vmatprep.subr.bf16.mxu0 %v907_v56 }
  0x4b   :  { %v362_v51 = vrot.slane %v357_v48, %v361_v47  ;;  %v568_v52 = vrot.slane %v563_v49, %v361_v47  ;;  %v467_v0 = vrot.slane %v462_v63, %v361_v47 }
  0x4d   :  { %910 = vmatpush1.bf16.msra.mxu0 %v909_v57 }
  0x4e   :  { %912 = vmatprep.subr.bf16.mxu0 %v911_v4 }
  0x51   :  { %914 = vmatpush1.bf16.msra.mxu0 %v913_v5 }
  0xf7   :  { %v698_v10 = vpop.f32.mrb[0].mxu0 }
  0xf8   :  { %v699_v12 = vpop.f32.mrb[1].mxu0 }
  0xf9   :  { %v733_v13 = vpop.f32.mrb[0].mxu1  ;;  %v700_v14 = vadd.f32 %v699_v12, %v698_v10 }
  0xfa   :  { %v734_v15 = vpop.f32.mrb[1].mxu1 }
  0xfb   :  { %v735_v16 = vadd.f32 %v734_v15, %v733_v13  ;;  %v197_v17 = vadd.f32 %v700_v14, %v662_v11 }
  0xfd   :  { %v267_v18 = vadd.f32 %v735_v16, %v197_v17 }
 0x117   :  { %v768_v19 = vpop.f32.mrb[2].mxu0 }
 0x118   :  { %v769_v20 = vpop.f32.mrb[3].mxu0 }
 0x119   :  { %v770_v21 = vadd.f32 %v769_v20, %v768_v19 }
 0x11b   :  { %v337_v26 = vadd.f32 %v770_v21, %v267_v18 }
 0x11d   :  { %v340_v28 = vmax.f32 %v337_v26, 0.0 }
 0x11f   :  { %663 = vmatmul.mubr.msk.f32.vlgmr.msra.gmra.mrb[2].mxu1 %vm369_vm0, %v340_v28  ;;  %665 = vmatmul.mubr.msk.f32.vlgmr.msra.gmra.mrb[4].mxu0 %vm369_vm0, %v340_v28 }
 0x120   :  { %886 = vmatpush1.bf16.msra.mxu1 %v885_v27  ;;  %538 = vmatprep.mubr.f32.mxu1 %v941_v9 }
 0x121   :  { %888 = vmatprep.subr.bf16.mxu1 %v887_v29 }
 0x124   :  { %890 = vmatpush1.bf16.msra.mxu1 %v889_v34 }
 0x125   :  { %892 = vmatprep.subr.bf16.mxu1 %v891_v35 }
 0x128   :  { %894 = vmatpush1.bf16.msra.mxu1 %v893_v40 }
 0x129   :  { %896 = vmatprep.subr.bf16.mxu1 %v895_v41 }
 0x12c   :  { %898 = vmatpush1.bf16.msra.mxu1 %v897_v44 }
 0x12f   :  { %664 = vmatmul.mubr.msk.f32.vlgmr.msra.gmra.mrb[4].mxu1 %vm369_vm0, %v340_v28 }
 0x1f2   :  { %v439_v55 = vpop.f32.mrb[2].mxu1  ;;  %v641_v56 = vpop.f32.mrb[4].mxu0 }
 0x1f3   :  { %v440_v57 = vadd.f32 %v439_v55, %v362_v51  ;;  %v642_v58 = vadd.f32 %v641_v56, %v568_v52  ;;  %v441_v59 = vpop.f32.mrb[3].mxu1  ;;  %v643_v60 = vpop.f32.mrb[5].mxu0 }
 0x1f4   :  { %v442_v61 = vadd.f32 %v441_v59, %v366_v53  ;;  %v644_v62 = vadd.f32 %v643_v60, %v572_v54 }
 0x1f5   :  { %444 = vst [vmem:[#allocation2] sm:$0xff] %v440_v57  ;;  %646 = vst [vmem:[#allocation2 + $0x20] sm:$0xff] %v642_v58 }
 0x1f6   :  { %445 = vst [vmem:[#allocation2 + $0x8] sm:$0xff] %v442_v61  ;;  %647 = vst [vmem:[#allocation2 + $0x28] sm:$0xff] %v644_v62 }
 0x202   :  { %v540_v2 = vpop.f32.mrb[4].mxu1 }
 0x203   :  { %v541_v3 = vadd.f32 %v540_v2, %v467_v0  ;;  %v542_v4 = vpop.f32.mrb[5].mxu1 }
 0x204   :  { %v543_v5 = vadd.f32 %v542_v4, %v471_v1 }
 0x205   :  { %545 = vst [vmem:[#allocation2 + $0x10] sm:$0xff] %v541_v3 }
 0x206   :  { %546 = vst [vmem:[#allocation2 + $0x18] sm:$0xff] %v543_v5 }
 0x207   :  { %928 = shalt.err (!%p925_p4)
}
 0x208   :  { %s929_s19 = scalar_lea.hbm %s1455_s5, 768 }
 0x209   :  { %p930_p5 = scmp.ne.s32.totalorder %s1455_s5, %s929_s19  ;;  %p933_p6 = scmp.lt.u32.totalorder %s929_s19, %s1455_s5 }
 0x20b   :  { %p935_p7 = pnand %p933_p6, %p930_p5 }
 0x20d   :  { %938 = shalt.err (!%p935_p7)
}
 0x20e   :  { %657 = dma.vmem_to_hbm [thread:$0]  %s655_s16, 768, %s1455_s5, [#allocation3]  }
 0x20f   :  { %939 = dma.done.wait [#allocation3], 768  }
 0x210   :  { %940 = vsyncadd [#allocation3], 4294966528 }
 0x211   :  { %661 = vsyncpa [#allocation3], 1 }

</bundles_post_ra>
